<compile_context>
chip_gen: v6e
topology: v6e:2x2x1
jax: 0.10.0
libtpu: 0.0.40
codegen_flags: <defaults>
</compile_context>

<pallas_src>
import jax
import jax.numpy as jnp
from jax.experimental import pallas as pl
from jax.experimental.pallas import tpu as pltpu


IN_FEATURES = 784
H1, H2 = 256, 128
H3_LOGICAL, H3_PAD = 64, 128
N_CLASSES, N_OUT_PAD = 10, 128
NEG_PAD = -1e30          # bias for padded classes: exp() of them contributes 0
TARGET_STEPS = 4         # aim for >= ~4 grid steps so v7x's 2 TCs both run


def _round_up(n, m):
    return ((n + m - 1) // m) * m


def mlp_kernel(x_ref, w1_ref, b1_ref, w2_ref, b2_ref,
               w3_ref, b3_ref, w4_ref, b4_ref, o_ref):
    """Fused 4-layer MLP + log_softmax for one (TB, 784) batch tile.

    x arrives in f32 and is cast to bf16 here (VPU op, hidden under DMA/MXU).
    Matmuls run bf16 on the MXU with f32 accumulation; bias add, ReLU and
    log_softmax stay in f32.
    """
    x = x_ref[...].astype(jnp.bfloat16)                            # (TB, 784)

    h1 = jnp.dot(x, w1_ref[...], preferred_element_type=jnp.float32) + b1_ref[...]
    h1 = jnp.maximum(h1, 0.0).astype(jnp.bfloat16)

    h2 = jnp.dot(h1, w2_ref[...], preferred_element_type=jnp.float32) + b2_ref[...]
    h2 = jnp.maximum(h2, 0.0).astype(jnp.bfloat16)

    h3 = jnp.dot(h2, w3_ref[...], preferred_element_type=jnp.float32) + b3_ref[...]
    h3 = jnp.maximum(h3, 0.0).astype(jnp.bfloat16)

    logits = jnp.dot(h3, w4_ref[...], preferred_element_type=jnp.float32) + b4_ref[...]

    # Numerically stable log_softmax over the lane-dense (128-wide) class axis.
    # Padded classes carry a -1e30 bias, so they never win the max and their
    # exp() is exactly 0 -> identical to a 10-class log_softmax.
    m = jnp.max(logits, axis=-1, keepdims=True)
    shifted = logits - m
    lse = jnp.log(jnp.sum(jnp.exp(shifted), axis=-1, keepdims=True))
    o_ref[...] = (shifted - lse).astype(o_ref.dtype)


def classifier_forward(x, kernel_params, *, tile_b=1024):
    """x: (B, 1, 28, 28) float32 (NCHW). Returns (B, 10) f32 log-probabilities.

    tile_b: max batch tile size. 1024 amortizes per-step overhead (~0.35 us)
    while keeping VMEM well under every generation's scoped limit; the tile is
    clamped so mid/large batches still produce multiple "parallel" grid steps.
    """
    b = x.shape[0]
    x_flat = x.reshape(b, -1)                     # free view; stays f32
    w1, b1, w2, b2, w3, b3, w4, b4 = kernel_params

    # Batch tiling: >= 8 rows (sublane granularity), <= tile_b, and small
    # enough that the grid has ~TARGET_STEPS steps for mid/large batches.
    tb_cap = max(8, _round_up(pl.cdiv(b, TARGET_STEPS), 8))
    tb = max(8, min(tile_b, tb_cap))
    grid = (pl.cdiv(b, tb),)                      # no wrapper-side batch pad

    # Weights/biases: constant index_map -> loaded once, VMEM-resident.
    def resident(a):
        return pl.BlockSpec(a.shape, lambda i: (0,) * a.ndim)

    mac = IN_FEATURES * H1 + H1 * H2 + H2 * H3_PAD + H3_PAD * N_OUT_PAD
    weight_bytes = 2 * mac + 4 * (H1 + H2 + H3_PAD + N_OUT_PAD)
    cost = pl.CostEstimate(
        flops=2 * b * mac,
        transcendentals=b * N_OUT_PAD,
        bytes_accessed=b * IN_FEATURES * 4        # x streamed in f32
        + weight_bytes
        + b * N_OUT_PAD * 4,
    )

    # Right-sized scoped VMEM (v5e default is only 16 MiB): x/out double
    # buffers + resident weights + f32 intermediates, with headroom,
    # capped at v7x's 64 MiB physical VMEM.
    vmem_need = (2 * tb * IN_FEATURES * 4
                 + 2 * tb * N_OUT_PAD * 4
                 + weight_bytes
                 + 4 * tb * (H1 + H2 + H3_PAD + N_OUT_PAD))
    vmem_limit = min(64 << 20, max(32 << 20, int(vmem_need * 1.5)))

    out = pl.pallas_call(
        mlp_kernel,
        out_shape=jax.ShapeDtypeStruct((b, N_OUT_PAD), jnp.float32),
        grid=grid,
        in_specs=[
            pl.BlockSpec((tb, IN_FEATURES), lambda i: (i, 0)),   # x: streamed per tile (f32)
            resident(w1), resident(b1),
            resident(w2), resident(b2),
            resident(w3), resident(b3),
            resident(w4), resident(b4),
        ],
        out_specs=pl.BlockSpec((tb, N_OUT_PAD), lambda i: (i, 0)),
        compiler_params=pltpu.CompilerParams(
            # Batch tiles are independent -> shard across TensorCores on v7x.
            dimension_semantics=("parallel",),
            vmem_limit_bytes=vmem_limit,
        ),
        cost_estimate=cost,
    )(x_flat, w1, b1, w2, b2, w3, b3, w4, b4)

    return out[:b, :N_CLASSES]


def init_params(key):
    """Deterministic init matching torch nn.Linear default (U[-1/sqrt(fan_in), +]).

    Logical (unpadded, f32) params. Weights stored (in_features, out_features);
    biases as (1, out)."""
    dims = [(IN_FEATURES, H1), (H1, H2), (H2, H3_LOGICAL), (H3_LOGICAL, N_CLASSES)]
    params = []
    keys = jax.random.split(key, 2 * len(dims))
    for i, (fan_in, fan_out) in enumerate(dims):
        bound = 1.0 / (fan_in ** 0.5)
        w = jax.random.uniform(keys[2 * i], (fan_in, fan_out),
                               minval=-bound, maxval=bound, dtype=jnp.float32)
        bias = jax.random.uniform(keys[2 * i + 1], (1, fan_out),
                                  minval=-bound, maxval=bound, dtype=jnp.float32)
        params.extend([w, bias])
    return tuple(params)


def prepare_kernel_params(params):
    """Pad fc3/fc4 to 128 lanes and cast weights to bf16 (biases stay f32)."""
    w1, b1, w2, b2, w3, b3, w4, b4 = params
    w3p = jnp.pad(w3, ((0, 0), (0, H3_PAD - H3_LOGICAL)))                 # zeros
    b3p = jnp.pad(b3, ((0, 0), (0, H3_PAD - H3_LOGICAL)))                 # zeros
    w4p = jnp.pad(w4, ((0, H3_PAD - H3_LOGICAL), (0, N_OUT_PAD - N_CLASSES)))
    b4p = jnp.pad(b4, ((0, 0), (0, N_OUT_PAD - N_CLASSES)),
                  constant_values=NEG_PAD)                                 # -1e30
    return (w1.astype(jnp.bfloat16), b1.astype(jnp.float32),
            w2.astype(jnp.bfloat16), b2.astype(jnp.float32),
            w3p.astype(jnp.bfloat16), b3p.astype(jnp.float32),
            w4p.astype(jnp.bfloat16), b4p.astype(jnp.float32))


def reference_forward(x, params):
    """Pure-JAX reference using the same mixed precision as the kernel."""
    w1, b1, w2, b2, w3, b3, w4, b4 = params
    h = x.reshape(x.shape[0], -1).astype(jnp.bfloat16)

    def layer(h, w, bias, relu):
        z = jnp.dot(h, w.astype(jnp.bfloat16),
                    preferred_element_type=jnp.float32) + bias
        return jnp.maximum(z, 0.0).astype(jnp.bfloat16) if relu else z

    h = layer(h, w1, b1, True)
    h = layer(h, w2, b2, True)
    h = layer(h, w3, b3, True)
    logits = layer(h, w4, b4, False)
    return jax.nn.log_softmax(logits, axis=1)


if __name__ == "__main__":
    key = jax.random.PRNGKey(0)
    kx, kp = jax.random.split(key)

    # Small MNIST-like input: batch=2, NCHW (2, 1, 28, 28) -> 784 features.
    x = jax.random.normal(kx, (2, 1, 28, 28), dtype=jnp.float32)
    logical_params = init_params(kp)
    kernel_params = prepare_kernel_params(logical_params)

    out = classifier_forward(x, kernel_params)
    out = jax.block_until_ready(out)

    ref = reference_forward(x, logical_params)
    assert out.shape == (2, 10), out.shape
    err = float(jnp.max(jnp.abs(out - ref)))
    assert jnp.allclose(out, ref, atol=1e-2, rtol=1e-2), f"mismatch vs reference: {err}"

    print("KERNEL_OK")
</pallas_src>

<mosaic_0001>
module attributes {stable_mosaic.version = 11 : i64} {
  func.func @mlp_kernel(%arg0: i32, %arg1: memref<8x784xf32, #tpu.memory_space<vmem>>, %arg2: memref<784x256xbf16, #tpu.memory_space<vmem>>, %arg3: memref<1x256xf32, #tpu.memory_space<vmem>>, %arg4: memref<256x128xbf16, #tpu.memory_space<vmem>>, %arg5: memref<1x128xf32, #tpu.memory_space<vmem>>, %arg6: memref<128x128xbf16, #tpu.memory_space<vmem>>, %arg7: memref<1x128xf32, #tpu.memory_space<vmem>>, %arg8: memref<128x128xbf16, #tpu.memory_space<vmem>>, %arg9: memref<1x128xf32, #tpu.memory_space<vmem>>, %arg10: memref<8x128xf32, #tpu.memory_space<vmem>>) attributes {dimension_semantics = [#tpu.dimension_semantics<parallel>], iteration_bounds = array<i64: 1>, scalar_prefetch = 0 : i64, scratch_operands = 0 : i64, tpu.core_type = #tpu.core_type<tc>, window_params = [{transform_indices = @transform_0, window_bounds = array<i64: 8, 784>}, {pipeline_mode = #tpu.pipeline_mode<synchronous>, transform_indices = @transform_1, window_bounds = array<i64: 784, 256>}, {pipeline_mode = #tpu.pipeline_mode<synchronous>, transform_indices = @transform_2, window_bounds = array<i64: 1, 256>}, {pipeline_mode = #tpu.pipeline_mode<synchronous>, transform_indices = @transform_3, window_bounds = array<i64: 256, 128>}, {pipeline_mode = #tpu.pipeline_mode<synchronous>, transform_indices = @transform_4, window_bounds = array<i64: 1, 128>}, {pipeline_mode = #tpu.pipeline_mode<synchronous>, transform_indices = @transform_5, window_bounds = array<i64: 128, 128>}, {pipeline_mode = #tpu.pipeline_mode<synchronous>, transform_indices = @transform_6, window_bounds = array<i64: 1, 128>}, {pipeline_mode = #tpu.pipeline_mode<synchronous>, transform_indices = @transform_7, window_bounds = array<i64: 128, 128>}, {pipeline_mode = #tpu.pipeline_mode<synchronous>, transform_indices = @transform_8, window_bounds = array<i64: 1, 128>}, {transform_indices = @transform_9, window_bounds = array<i64: 8, 128>}]} {
    %c0 = arith.constant 0 : index
    %c0_0 = arith.constant 0 : index
    %0 = vector.load %arg1[%c0, %c0_0] : memref<8x784xf32, #tpu.memory_space<vmem>>, vector<8x784xf32>
    %1 = arith.truncf %0 : vector<8x784xf32> to vector<8x784xbf16>
    %c0_1 = arith.constant 0 : index
    %c0_2 = arith.constant 0 : index
    %2 = vector.load %arg2[%c0_1, %c0_2] : memref<784x256xbf16, #tpu.memory_space<vmem>>, vector<784x256xbf16>
    %cst = arith.constant dense<0.000000e+00> : vector<8x256xf32>
    %3 = tpu.matmul %1, %2, %cst {dimension_numbers = #tpu.dot_dimension_numbers<[1], [0], [0], [1], [0, 0, 1, 1], [], []>} : vector<8x784xbf16>, vector<784x256xbf16>, vector<8x256xf32> -> vector<8x256xf32>
    %c0_3 = arith.constant 0 : index
    %c0_4 = arith.constant 0 : index
    %4 = vector.load %arg3[%c0_3, %c0_4] : memref<1x256xf32, #tpu.memory_space<vmem>>, vector<1x256xf32>
    %5 = vector.broadcast %4 : vector<1x256xf32> to vector<8x256xf32>
    %6 = arith.addf %3, %5 : vector<8x256xf32>
    %cst_5 = arith.constant 0.000000e+00 : f32
    %7 = vector.broadcast %cst_5 : f32 to vector<8x256xf32>
    %8 = arith.maximumf %6, %7 : vector<8x256xf32>
    %9 = arith.truncf %8 : vector<8x256xf32> to vector<8x256xbf16>
    %c0_6 = arith.constant 0 : index
    %c0_7 = arith.constant 0 : index
    %10 = vector.load %arg4[%c0_6, %c0_7] : memref<256x128xbf16, #tpu.memory_space<vmem>>, vector<256x128xbf16>
    %cst_8 = arith.constant dense<0.000000e+00> : vector<8x128xf32>
    %11 = tpu.matmul %9, %10, %cst_8 {dimension_numbers = #tpu.dot_dimension_numbers<[1], [0], [0], [1], [0, 0, 1, 1], [], []>} : vector<8x256xbf16>, vector<256x128xbf16>, vector<8x128xf32> -> vector<8x128xf32>
    %c0_9 = arith.constant 0 : index
    %c0_10 = arith.constant 0 : index
    %12 = vector.load %arg5[%c0_9, %c0_10] : memref<1x128xf32, #tpu.memory_space<vmem>>, vector<1x128xf32>
    %13 = vector.broadcast %12 : vector<1x128xf32> to vector<8x128xf32>
    %14 = arith.addf %11, %13 : vector<8x128xf32>
    %cst_11 = arith.constant 0.000000e+00 : f32
    %15 = vector.broadcast %cst_11 : f32 to vector<8x128xf32>
    %16 = arith.maximumf %14, %15 : vector<8x128xf32>
    %17 = arith.truncf %16 : vector<8x128xf32> to vector<8x128xbf16>
    %c0_12 = arith.constant 0 : index
    %c0_13 = arith.constant 0 : index
    %18 = vector.load %arg6[%c0_12, %c0_13] : memref<128x128xbf16, #tpu.memory_space<vmem>>, vector<128x128xbf16>
    %cst_14 = arith.constant dense<0.000000e+00> : vector<8x128xf32>
    %19 = tpu.matmul %17, %18, %cst_14 {dimension_numbers = #tpu.dot_dimension_numbers<[1], [0], [0], [1], [0, 0, 1, 1], [], []>} : vector<8x128xbf16>, vector<128x128xbf16>, vector<8x128xf32> -> vector<8x128xf32>
    %c0_15 = arith.constant 0 : index
    %c0_16 = arith.constant 0 : index
    %20 = vector.load %arg7[%c0_15, %c0_16] : memref<1x128xf32, #tpu.memory_space<vmem>>, vector<1x128xf32>
    %21 = vector.broadcast %20 : vector<1x128xf32> to vector<8x128xf32>
    %22 = arith.addf %19, %21 : vector<8x128xf32>
    %cst_17 = arith.constant 0.000000e+00 : f32
    %23 = vector.broadcast %cst_17 : f32 to vector<8x128xf32>
    %24 = arith.maximumf %22, %23 : vector<8x128xf32>
    %25 = arith.truncf %24 : vector<8x128xf32> to vector<8x128xbf16>
    %c0_18 = arith.constant 0 : index
    %c0_19 = arith.constant 0 : index
    %26 = vector.load %arg8[%c0_18, %c0_19] : memref<128x128xbf16, #tpu.memory_space<vmem>>, vector<128x128xbf16>
    %cst_20 = arith.constant dense<0.000000e+00> : vector<8x128xf32>
    %27 = tpu.matmul %25, %26, %cst_20 {dimension_numbers = #tpu.dot_dimension_numbers<[1], [0], [0], [1], [0, 0, 1, 1], [], []>} : vector<8x128xbf16>, vector<128x128xbf16>, vector<8x128xf32> -> vector<8x128xf32>
    %c0_21 = arith.constant 0 : index
    %c0_22 = arith.constant 0 : index
    %28 = vector.load %arg9[%c0_21, %c0_22] : memref<1x128xf32, #tpu.memory_space<vmem>>, vector<1x128xf32>
    %29 = vector.broadcast %28 : vector<1x128xf32> to vector<8x128xf32>
    %30 = arith.addf %27, %29 : vector<8x128xf32>
    %cst_23 = arith.constant dense<0xFF800000> : vector<8xf32>
    %31 = vector.multi_reduction <maximumf>, %30, %cst_23 [1] : vector<8x128xf32> to vector<8xf32>
    %32 = vector.shape_cast %31 : vector<8xf32> to vector<8x1xf32>
    %33 = vector.broadcast %32 : vector<8x1xf32> to vector<8x128xf32>
    %34 = arith.subf %30, %33 : vector<8x128xf32>
    %35 = math.exp %34 : vector<8x128xf32>
    %cst_24 = arith.constant dense<0.000000e+00> : vector<8xf32>
    %36 = vector.multi_reduction <add>, %35, %cst_24 [1] : vector<8x128xf32> to vector<8xf32>
    %37 = vector.shape_cast %36 : vector<8xf32> to vector<8x1xf32>
    %38 = math.log %37 : vector<8x1xf32>
    %39 = vector.broadcast %38 : vector<8x1xf32> to vector<8x128xf32>
    %40 = arith.subf %34, %39 : vector<8x128xf32>
    %c0_25 = arith.constant 0 : index
    %c0_26 = arith.constant 0 : index
    %41 = vector.load %arg10[%c0_25, %c0_26] : memref<8x128xf32, #tpu.memory_space<vmem>>, vector<8x128xf32>
    tpu.vector_store %arg10[%c0_25, %c0_26], %40 {strides = array<i32>} : memref<8x128xf32, #tpu.memory_space<vmem>>, vector<8x128xf32>,
    return
  }
  func.func @transform_0(%arg0: i32) -> (i32, i32) {
    %c0_i32 = arith.constant 0 : i32
    %c0_i32_0 = arith.constant 0 : i32
    return %arg0, %c0_i32 : i32, i32
  }
  func.func @transform_1(%arg0: i32) -> (i32, i32) {
    %c0_i32 = arith.constant 0 : i32
    %c0_i32_0 = arith.constant 0 : i32
    %c0_i32_1 = arith.constant 0 : i32
    return %c0_i32, %c0_i32_0 : i32, i32
  }
  func.func @transform_2(%arg0: i32) -> (i32, i32) {
    %c0_i32 = arith.constant 0 : i32
    %c0_i32_0 = arith.constant 0 : i32
    %c0_i32_1 = arith.constant 0 : i32
    return %c0_i32, %c0_i32_0 : i32, i32
  }
  func.func @transform_3(%arg0: i32) -> (i32, i32) {
    %c0_i32 = arith.constant 0 : i32
    %c0_i32_0 = arith.constant 0 : i32
    %c0_i32_1 = arith.constant 0 : i32
    return %c0_i32, %c0_i32_0 : i32, i32
  }
  func.func @transform_4(%arg0: i32) -> (i32, i32) {
    %c0_i32 = arith.constant 0 : i32
    %c0_i32_0 = arith.constant 0 : i32
    %c0_i32_1 = arith.constant 0 : i32
    return %c0_i32, %c0_i32_0 : i32, i32
  }
  func.func @transform_5(%arg0: i32) -> (i32, i32) {
    %c0_i32 = arith.constant 0 : i32
    %c0_i32_0 = arith.constant 0 : i32
    %c0_i32_1 = arith.constant 0 : i32
    return %c0_i32, %c0_i32_0 : i32, i32
  }
  func.func @transform_6(%arg0: i32) -> (i32, i32) {
    %c0_i32 = arith.constant 0 : i32
    %c0_i32_0 = arith.constant 0 : i32
    %c0_i32_1 = arith.constant 0 : i32
    return %c0_i32, %c0_i32_0 : i32, i32
  }
  func.func @transform_7(%arg0: i32) -> (i32, i32) {
    %c0_i32 = arith.constant 0 : i32
    %c0_i32_0 = arith.constant 0 : i32
    %c0_i32_1 = arith.constant 0 : i32
    return %c0_i32, %c0_i32_0 : i32, i32
  }
  func.func @transform_8(%arg0: i32) -> (i32, i32) {
    %c0_i32 = arith.constant 0 : i32
    %c0_i32_0 = arith.constant 0 : i32
    %c0_i32_1 = arith.constant 0 : i32
    return %c0_i32, %c0_i32_0 : i32, i32
  }
  func.func @transform_9(%arg0: i32) -> (i32, i32) {
    %c0_i32 = arith.constant 0 : i32
    %c0_i32_0 = arith.constant 0 : i32
    return %arg0, %c0_i32 : i32, i32
  }
}

</mosaic_0001>

<bundles_post_ra>
// kernel: tpu_custom_call.1
= control target key start
LH: loop header
LB: loop body
LE: loop exit
PB: predicated region body
PF: predicated region fallthrough
CT: control target
= control target key end

     0   :  { %14 = vsyncpa [#allocation3], 0  ;;  %s2102_s0 = inlined_call_operand.hbm [shape: f32[2,784], index: 0, kind: input, shape index: {}]   ;;  %s2103_s1 = inlined_call_operand.hbm [shape: bf16[784,256], index: 1, kind: input, shape index: {}]   ;;  %s2104_s2 = inlined_call_operand.vmem [shape: f32[1,256], index: 2, kind: input, shape index: {}]   ;;  %s2105_s3 = inlined_call_operand.hbm [shape: bf16[256,128], index: 3, kind: input, shape index: {}]   ;;  %s2106_s4 = inlined_call_operand.vmem [shape: f32[1,128], index: 4, kind: input, shape index: {}]   ;;  %s2107_s5 = inlined_call_operand.hbm [shape: bf16[128,128], index: 5, kind: input, shape index: {}]   ;;  %s2108_s6 = inlined_call_operand.vmem [shape: f32[1,128], index: 6, kind: input, shape index: {}]   ;;  %s2109_s7 = inlined_call_operand.hbm [shape: bf16[128,128], index: 7, kind: input, shape index: {}]   ;;  %s2110_s8 = inlined_call_operand.vmem [shape: f32[1,128], index: 8, kind: input, shape index: {}]   ;;  %s2111_s9 = inlined_call_operand.hbm [shape: f32[2,128], index: 9, kind: output, shape index: {}]  }
   0x1   :  { %15 = vsyncpa [#allocation6], 0 }
   0x2   :  { %16 = vsyncpa [#allocation9], 0 }
   0x3   :  { %17 = vsyncpa [#allocation4], 0 }
   0x4   :  { %22 = vsyncadd [#allocation3], 672  ;;  %s1961_s30 = smov [#allocation5]  }
   0x5   :  { %s35_s10 = sshll.u32 %s1961_s30, 4  ;;  %s36_s10 = int_to_ptr.vmem [resolvable:$true] %s35_s10 }
   0x6   :  { %s1841_s11 = scalar_lea.vmem %s36_s10, 12544  ;;  %p1846_p1 = scmp.lt.s32.totalorder %s36_s10, %s36_s10 }
   0x7   :  { %p1842_p0 = scmp.ne.s32.totalorder %s36_s10, %s1841_s11  ;;  %p1847_p2 = scmp.lt.s32.totalorder %s1841_s11, %s1841_s11 }
   0x9   :  { %p1848_p3 = por %p1847_p2, %p1846_p1 }
   0xb   :  { %p1849_p4 = pnand %p1848_p3, %p1842_p0 }
   0xd   :  { %1852 = shalt.err (!%p1849_p4)
}
   0xe   :  { %s1962_s12 = smov 128   ;;  %s1963_s13 = smov 8  }
   0xf   :  { %41 = dma.hbm_to_vmem [thread:$0]  %s2103_s1, 12544, %s36_s10, [#allocation6], %s1962_s12, %s1962_s12, %s1963_s13  }
  0x10   :  { %s1964_s16 = smov [#allocation8]   ;;  %s1965_s18 = smov [#allocation2]  }
  0x11   :  { %s63_s17 = sshll.u32 %s1964_s16, 4  ;;  %s23_s19 = sshll.u32 %s1965_s18, 4  ;;  %s64_s17 = int_to_ptr.vmem [resolvable:$true] %s63_s17  ;;  %s24_s19 = int_to_ptr.vmem [resolvable:$true] %s23_s19 }
  0x12   :  { %s1861_s20 = scalar_lea.vmem %s64_s17, 1024  ;;  %p1866_p6 = scmp.lt.s32.totalorder %s64_s17, %s64_s17 }
  0x13   :  { %p1862_p5 = scmp.ne.s32.totalorder %s64_s17, %s1861_s20  ;;  %p1867_p7 = scmp.lt.s32.totalorder %s1861_s20, %s1861_s20 }
  0x15   :  { %p1868_p8 = por %p1867_p7, %p1866_p6 }
  0x17   :  { %p1869_p9 = pnand %p1868_p8, %p1862_p5 }
  0x19   :  { %1872 = shalt.err (!%p1869_p9)
}
  0x1a   :  { %s1966_s21 = smov 64   ;;  %s1967_s22 = smov 4  }
  0x1b   :  { %69 = dma.hbm_to_vmem [thread:$0]  %s2107_s5, 1024, %s64_s17, [#allocation9], %s1966_s21, %s1966_s21, %s1967_s22  }
  0x1c   :  { %s1881_s1 = scalar_lea.vmem %s24_s19, 224  ;;  %s1885_s25 = scalar_lea.vmem %s24_s19, 896 }
  0x1d   :  { %p1882_p10 = scmp.ne.s32.totalorder %s24_s19, %s1881_s1  ;;  %p1886_p11 = scmp.lt.s32.totalorder %s24_s19, %s24_s19 }
  0x1e   :  { %p1887_p12 = scmp.lt.s32.totalorder %s1885_s25, %s1881_s1 }
  0x20   :  { %p1888_p13 = por %p1887_p12, %p1886_p11 }
  0x22   :  { %p1889_p0 = pnand %p1888_p13, %p1882_p10 }
  0x24   :  { %1892 = shalt.err (!%p1889_p0)
}
  0x25   :  { %s1968_s26 = smov 224   ;;  %s1969_s27 = smov 14  }
  0x26   :  { %29 = dma.hbm_to_vmem [thread:$0]  %s2102_s0, 224, %s24_s19, [#allocation3], %s1968_s26, %s1968_s26, %s1969_s27  }
  0x27   :  { %s1970_s30 = smov [#allocation7]   ;;  %s1971_s11 = smov [#allocation10]  }
  0x28   :  { %s49_s10 = sshll.u32 %s1970_s30, 4  ;;  %s77_s5 = sshll.u32 %s1971_s11, 4  ;;  %s50_s10 = int_to_ptr.vmem [resolvable:$true] %s49_s10  ;;  %s78_s5 = int_to_ptr.vmem [resolvable:$true] %s77_s5 }
  0x29   :  { %s1901_s12 = scalar_lea.vmem %s50_s10, 2048  ;;  %p1906_p2 = scmp.lt.s32.totalorder %s50_s10, %s50_s10 }
  0x2a   :  { %p1902_p1 = scmp.ne.s32.totalorder %s50_s10, %s1901_s12  ;;  %p1907_p3 = scmp.lt.s32.totalorder %s1901_s12, %s1901_s12 }
  0x2c   :  { %p1908_p4 = por %p1907_p3, %p1906_p2 }
  0x2e   :  { %p1909_p5 = pnand %p1908_p4, %p1902_p1 }
  0x30   :  { %1912 = shalt.err (!%p1909_p5)
}
  0x31   :  { %55 = dma.hbm_to_vmem [thread:$0]  %s2105_s3, 2048, %s50_s10, [#allocation6], %s1966_s21, %s1966_s21, %s1967_s22  }
  0x32   :  { %s1921_s0 = scalar_lea.vmem %s78_s5, 1024  ;;  %p1926_p7 = scmp.lt.s32.totalorder %s78_s5, %s78_s5 }
  0x33   :  { %p1922_p6 = scmp.ne.s32.totalorder %s78_s5, %s1921_s0  ;;  %p1927_p8 = scmp.lt.s32.totalorder %s1921_s0, %s1921_s0 }
  0x35   :  { %p1928_p9 = por %p1927_p8, %p1926_p7 }
  0x37   :  { %p1929_p10 = pnand %p1928_p9, %p1922_p6 }
  0x39   :  { %1932 = shalt.err (!%p1929_p10)
}
  0x3a   :  { %83 = dma.hbm_to_vmem [thread:$0]  %s2109_s7, 1024, %s78_s5, [#allocation9], %s1966_s21, %s1966_s21, %s1967_s22  }
  0x3b   :  { %1953 = dma.done.wait [#allocation3], 896  }
  0x3c   :  { %1954 = vsyncadd [#allocation3], 4294966400 }
  0x3d   :  { %1955 = dma.done.wait [#allocation6], 14592  }
  0x3e   :  { %1956 = vsyncadd [#allocation6], 4294952704 }
  0x3f   :  { %1957 = dma.done.wait [#allocation9], 2048  }
  0x40   :  { %1958 = vsyncadd [#allocation9], 4294965248  ;;  %v1638_v0 = vld [vmem:[#allocation5 + $0x74] ss:$8 sps:$4 sm:$0xff]   ;;  %v1640_v1 = vld [vmem:[#allocation5 + $0x70] ss:$8 sps:$4 sm:$0xff]   ;;  %v125_v39 = vlaneseq }
  0x41   :  { %807 = vmatprep.subr.bf16.mxu0 %v1638_v0  ;;  %v1641_v2 = vld [vmem:[#allocation5 + $0x174] ss:$8 sps:$4 sm:$0xff]   ;;  %v1643_v3 = vld [vmem:[#allocation5 + $0x170] ss:$8 sps:$4 sm:$0xff]   ;;  %v1644_v4 = vld [vmem:[#allocation5 + $0x64] ss:$8 sps:$4 sm:$0xff]  }
  0x42   :  { %808 = vmatpush1.bf16.msra.mxu0 %v1640_v1  ;;  %v1646_v5 = vld [vmem:[#allocation5 + $0x60] ss:$8 sps:$4 sm:$0xff]   ;;  %848 = vmatprep.subr.bf16.mxu1 %v1641_v2  ;;  %v1647_v6 = vld [vmem:[#allocation5 + $0x164] ss:$8 sps:$4 sm:$0xff]   ;;  %v1650_v8 = vld [vmem:[#allocation5 + $0x54] ss:$8 sps:$4 sm:$0xff]  }
  0x43   :  { %849 = vmatpush1.bf16.msra.mxu1 %v1643_v3  ;;  %809 = vmatprep.subr.bf16.mxu0 %v1644_v4  ;;  %v1649_v7 = vld [vmem:[#allocation5 + $0x160] ss:$8 sps:$4 sm:$0xff]   ;;  %v1652_v9 = vld [vmem:[#allocation5 + $0x50] ss:$8 sps:$4 sm:$0xff]   ;;  %v1653_v10 = vld [vmem:[#allocation5 + $0x154] ss:$8 sps:$4 sm:$0xff]  }
  0x44   :  { %850 = vmatprep.subr.bf16.mxu1 %v1647_v6  ;;  %v1656_v11 = vld [vmem:[#allocation5 + $0x44] ss:$8 sps:$4 sm:$0xff]   ;;  %v1655_v12 = vld [vmem:[#allocation5 + $0x150] ss:$8 sps:$4 sm:$0xff]   ;;  %v1658_v14 = vld [vmem:[#allocation5 + $0x40] ss:$8 sps:$4 sm:$0xff]  }
  0x45   :  { %v1659_v13 = vld [vmem:[#allocation5 + $0x144] ss:$8 sps:$4 sm:$0xff]   ;;  %v1662_v15 = vld [vmem:[#allocation5 + $0x34] ss:$8 sps:$4 sm:$0xff]   ;;  %v1661_v16 = vld [vmem:[#allocation5 + $0x140] ss:$8 sps:$4 sm:$0xff]  }
  0x46   :  { %810 = vmatpush1.bf16.msra.mxu0 %v1646_v5  ;;  %v1665_v17 = vld [vmem:[#allocation5 + $0x134] ss:$8 sps:$4 sm:$0xff]   ;;  %v1664_v18 = vld [vmem:[#allocation5 + $0x30] ss:$8 sps:$4 sm:$0xff]   ;;  %v1668_v19 = vld [vmem:[#allocation5 + $0x24] ss:$8 sps:$4 sm:$0xff]  }
  0x47   :  { %811 = vmatprep.subr.bf16.mxu0 %v1650_v8  ;;  %851 = vmatpush1.bf16.msra.mxu1 %v1649_v7  ;;  %v1667_v20 = vld [vmem:[#allocation5 + $0x130] ss:$8 sps:$4 sm:$0xff]   ;;  %v1671_v21 = vld [vmem:[#allocation5 + $0x124] ss:$8 sps:$4 sm:$0xff]   ;;  %v1670_v22 = vld [vmem:[#allocation5 + $0x20] ss:$8 sps:$4 sm:$0xff]  }
  0x48   :  { %852 = vmatprep.subr.bf16.mxu1 %v1653_v10  ;;  %v1674_v23 = vld [vmem:[#allocation5 + $0x14] ss:$8 sps:$4 sm:$0xff]   ;;  %v1673_v24 = vld [vmem:[#allocation5 + $0x120] ss:$8 sps:$4 sm:$0xff]   ;;  %v1676_v26 = vld [vmem:[#allocation5 + $0x10] ss:$8 sps:$4 sm:$0xff]  }
  0x49   :  { %v1677_v25 = vld [vmem:[#allocation5 + $0x114] ss:$8 sps:$4 sm:$0xff]   ;;  %v1680_v27 = vld [vmem:[#allocation5 + $0x4] ss:$8 sps:$4 sm:$0xff]   ;;  %v1679_v28 = vld [vmem:[#allocation5 + $0x110] ss:$8 sps:$4 sm:$0xff]  }
  0x4a   :  { %812 = vmatpush1.bf16.msra.mxu0 %v1652_v9  ;;  %v1683_v29 = vld [vmem:[#allocation5 + $0x104] ss:$8 sps:$4 sm:$0xff]   ;;  %v1682_v30 = vld [vmem:[#allocation5] ss:$8 sps:$4 sm:$0xff]   ;;  %v1686_v31 = vld [vmem:[#allocation5 + $0xf4] ss:$8 sps:$4 sm:$0xff]  }
  0x4b   :  { %813 = vmatprep.subr.bf16.mxu0 %v1656_v11  ;;  %853 = vmatpush1.bf16.msra.mxu1 %v1655_v12  ;;  %v1685_v32 = vld [vmem:[#allocation5 + $0x100] ss:$8 sps:$4 sm:$0xff]   ;;  %v1689_v33 = vld [vmem:[#allocation5 + $0x1f4] ss:$8 sps:$4 sm:$0xff]   ;;  %v1688_v34 = vld [vmem:[#allocation5 + $0xf0] ss:$8 sps:$4 sm:$0xff]  }
  0x4c   :  { %854 = vmatprep.subr.bf16.mxu1 %v1659_v13  ;;  %v1692_v35 = vld [vmem:[#allocation5 + $0xe4] ss:$8 sps:$4 sm:$0xff]   ;;  %v1691_v36 = vld [vmem:[#allocation5 + $0x1f0] ss:$8 sps:$4 sm:$0xff]   ;;  %v1972_v37 = vmov 1983009808  }
  0x4d   :  { %v123_v38 = vunpack.c.l.s4 %v1972_v37  ;;  %v1695_v40 = vld [vmem:[#allocation5 + $0x1e4] ss:$8 sps:$4 sm:$0xff]   ;;  %v1694_v41 = vld [vmem:[#allocation5 + $0xe0] ss:$8 sps:$4 sm:$0xff]   ;;  %v1698_v42 = vld [vmem:[#allocation5 + $0xd4] ss:$8 sps:$4 sm:$0xff]  }
  0x4e   :  { %814 = vmatpush1.bf16.msra.mxu0 %v1658_v14  ;;  %v1697_v43 = vld [vmem:[#allocation5 + $0x1e0] ss:$8 sps:$4 sm:$0xff]   ;;  %v2053_v45 = vshrl.u32 %v125_v39, 7  ;;  %v1701_v46 = vld [vmem:[#allocation5 + $0x1d4] ss:$8 sps:$4 sm:$0xff]   ;;  %vm803_vm0 = vcmask 130048  }
  0x4f   :  { %815 = vmatprep.subr.bf16.mxu0 %v1662_v15  ;;  %855 = vmatpush1.bf16.msra.mxu1 %v1661_v16  ;;  %v124_v44 = vunpack.c.0.s8 %v123_v38  ;;  %v1700_v47 = vld [vmem:[#allocation5 + $0xd0] ss:$8 sps:$4 sm:$0xff]   ;;  %v1704_v49 = vld [vmem:[#allocation5 + $0xc4] ss:$8 sps:$4 sm:$0xff]   ;;  %v1706_v50 = vld [vmem:[#allocation5 + $0xc0] ss:$8 sps:$4 sm:$0xff]  }
  0x50   :  { %856 = vmatprep.subr.bf16.mxu1 %v1665_v17  ;;  %v1703_v48 = vld [vmem:[#allocation5 + $0x1d0] ss:$8 sps:$4 sm:$0xff]   ;;  %v1707_v52 = vld [vmem:[#allocation5 + $0x1c4] ss:$8 sps:$4 sm:$0xff]   ;;  %v1710_v54 = vld [vmem:[#allocation5 + $0xb4] ss:$8 sps:$4 sm:$0xff]  }
  0x51   :  { %v2056_v51 = vsub.s32 %v124_v44, %v2053_v45  ;;  %v1733_v53 = vld [vmem:[#allocation2] ss:$14 sps:$4 sm:$0xff]   ;;  %v1735_v55 = vld [vmem:[#allocation2 + $0x1c] ss:$14 sps:$4 sm:$0xff]   ;;  %v1741_v60 = vld [vmem:[#allocation2 + $0x4] ss:$14 sps:$4 sm:$0xff]  }
  0x52   :  { %816 = vmatpush1.bf16.msra.mxu0 %v1664_v18  ;;  %v1709_v56 = vld [vmem:[#allocation5 + $0x1c0] ss:$8 sps:$4 sm:$0xff]   ;;  %v1713_v57 = vld [vmem:[#allocation5 + $0x1b4] ss:$8 sps:$4 sm:$0xff]   ;;  %v1712_v62 = vld [vmem:[#allocation5 + $0xb0] ss:$8 sps:$4 sm:$0xff]  }
  0x53   :  { %817 = vmatprep.subr.bf16.mxu0 %v1668_v19  ;;  %857 = vmatpush1.bf16.msra.mxu1 %v1667_v20  ;;  %v128_v58 = vrot.slane %v1733_v53, %v2056_v51  ;;  %v142_v59 = vrot.slane %v1735_v55, %v2056_v51  ;;  %v1742_v61 = vld [vmem:[#allocation2 + $0x20] ss:$14 sps:$4 sm:$0xff]   ;;  %v1716_v63 = vld [vmem:[#allocation5 + $0xa4] ss:$8 sps:$4 sm:$0xff]   ;;  %v135_v1 = vrot.slane %v1741_v60, %v2056_v51  ;;  %vm1975_vm1 = vmmov 0  }
  0x54   :  { %858 = vmatprep.subr.bf16.mxu1 %v1671_v21  ;;  %v149_v2 = vrot.slane %v1742_v61, %v2056_v51  ;;  %v1715_v3 = vld [vmem:[#allocation5 + $0x1b0] ss:$8 sps:$4 sm:$0xff]   ;;  %v1719_v4 = vld [vmem:[#allocation5 + $0x1a4] ss:$8 sps:$4 sm:$0xff]   ;;  %v1718_v7 = vld [vmem:[#allocation5 + $0xa0] ss:$8 sps:$4 sm:$0xff]  }
  0x55   :  { %v151_v0 = vcombine.high %v128_v58, %v142_v59  ;;  %v1722_v8 = vld [vmem:[#allocation5 + $0x94] ss:$8 sps:$4 sm:$0xff]   ;;  %v1721_v10 = vld [vmem:[#allocation5 + $0x1a0] ss:$8 sps:$4 sm:$0xff]   ;;  %v1724_v12 = vld [vmem:[#allocation5 + $0x90] ss:$8 sps:$4 sm:$0xff]   ;;  %v150_v16 = vcombine.low %v128_v58, %v142_v59 }
  0x56   :  { %818 = vmatpush1.bf16.msra.mxu0 %v1670_v22  ;;  %v153_v6 = vcombine.high %v135_v1, %v149_v2  ;;  %v1725_v11 = vld [vmem:[#allocation5 + $0x194] ss:$8 sps:$4 sm:$0xff]   ;;  %v1728_v13 = vld [vmem:[#allocation5 + $0x84] ss:$8 sps:$4 sm:$0xff]   ;;  %v1727_v14 = vld [vmem:[#allocation5 + $0x190] ss:$8 sps:$4 sm:$0xff]   ;;  %v152_v19 = vcombine.low %v135_v1, %v149_v2 }
  0x57   :  { %819 = vmatprep.subr.bf16.mxu0 %v1674_v23  ;;  %859 = vmatpush1.bf16.msra.mxu1 %v1673_v24  ;;  %v197_v5 = vpack.c.bf16 %v151_v0, %v151_v0  ;;  %v1731_v15 = vld [vmem:[#allocation5 + $0x184] ss:$8 sps:$4 sm:$0xff]   ;;  %v1730_v17 = vld [vmem:[#allocation5 + $0x80] ss:$8 sps:$4 sm:$0xff]   ;;  %v1740_v18 = vld [vmem:[#allocation5 + $0x274] ss:$8 sps:$4 sm:$0xff]   ;;  %v196_v21 = vpack.c.bf16 %v150_v16, %v150_v16 }
  0x58   :  { %860 = vmatprep.subr.bf16.mxu1 %v1677_v25  ;;  %v199_v9 = vpack.c.bf16 %v153_v6, %v153_v6  ;;  %v1737_v20 = vld [vmem:[#allocation5 + $0x180] ss:$8 sps:$4 sm:$0xff]   ;;  %v1738_v22 = vld [vmem:[#allocation5 + $0x270] ss:$8 sps:$4 sm:$0xff]   ;;  %v198_v23 = vpack.c.bf16 %v152_v19, %v152_v19  ;;  %v1745_v24 = vld [vmem:[#allocation5 + $0x264] ss:$8 sps:$4 sm:$0xff]  }
  0x59   :  { %839 = vmatprep.mubr.bf16.mxu0 %v197_v5  ;;  %v1785_v25 = vld [vmem:[#allocation5 + $0x300] ss:$8 sps:$4 sm:$0xff]   ;;  %v1764_v55 = vld [vmem:[#allocation5 + $0x2f0] ss:$8 sps:$4 sm:$0xff]   ;;  %v1772_v58 = vld [vmem:[#allocation5 + $0x2d4] ss:$8 sps:$4 sm:$0xff]  }
  0x5a   :  { %820 = vmatpush1.bf16.msra.mxu0 %v1676_v26  ;;  %880 = vmatprep.mubr.bf16.mxu1 %v199_v9  ;;  %v1787_v26 = vld [vmem:[#allocation5 + $0x304] ss:$8 sps:$4 sm:$0xff]   ;;  %v1749_v39 = vld [vmem:[#allocation5 + $0x240] ss:$8 sps:$4 sm:$0xff]   ;;  %v1770_v59 = vld [vmem:[#allocation5 + $0x2d0] ss:$8 sps:$4 sm:$0xff]  }
  0x5b   :  { %821 = vmatprep.subr.bf16.mxu0 %v1680_v27  ;;  %861 = vmatpush1.bf16.msra.mxu1 %v1679_v28  ;;  %v1743_v27 = vld [vmem:[#allocation5 + $0x260] ss:$8 sps:$4 sm:$0xff]   ;;  %v1748_v28 = vld [vmem:[#allocation5 + $0x254] ss:$8 sps:$4 sm:$0xff]   ;;  %v1775_v60 = vld [vmem:[#allocation5 + $0x2c4] ss:$8 sps:$4 sm:$0xff]  }
  0x5c   :  { %862 = vmatprep.subr.bf16.mxu1 %v1683_v29  ;;  %v1746_v29 = vld [vmem:[#allocation5 + $0x250] ss:$8 sps:$4 sm:$0xff]   ;;  %v1761_v53 = vld [vmem:[#allocation5 + $0x200] ss:$8 sps:$4 sm:$0xff]   ;;  %v1781_v0 = vld [vmem:[#allocation5 + $0x2a4] ss:$8 sps:$4 sm:$0xff]  }
  0x5d   :  { %v1773_v61 = vld [vmem:[#allocation5 + $0x2c0] ss:$8 sps:$4 sm:$0xff]   ;;  %v1784_v2 = vld [vmem:[#allocation5 + $0x294] ss:$8 sps:$4 sm:$0xff]  }
  0x5e   :  { %822 = vmatpush1.bf16.msra.mxu0 %v1682_v30  ;;  %v1973_v30 = vmov 0   ;;  %v1779_v1 = vld [vmem:[#allocation5 + $0x2a0] ss:$8 sps:$4 sm:$0xff]  }
  0x5f   :  { %823 = vmatprep.subr.bf16.mxu0 %v1686_v31  ;;  %863 = vmatpush1.bf16.msra.mxu1 %v1685_v32  ;;  %v1791_v31 = vld [vmem:[#allocation2 + $0xc] ss:$14 sps:$4 sm:$0x33]   ;;  %v1793_v32 = vld [vmem:[#allocation2 + $0x28] ss:$14 sps:$4 sm:$0x33]  }
  0x60   :  { %864 = vmatprep.subr.bf16.mxu1 %v1689_v33  ;;  %v1795_v33 = vld [vmem:[#allocation2 + $0x8] ss:$14 sps:$4 sm:$0xff]   ;;  %v185_v37 = vrot.slane %v1793_v32, %v2056_v51  ;;  %v1798_v9 = vld [vmem:[#allocation7 + $0x38] sm:$0xff]  }
  0x61   :  { %v164_v38 = vrot.slane %v1795_v33, %v2056_v51  ;;  %v1788_v6 = vld [vmem:[#allocation5 + $0x280] ss:$8 sps:$4 sm:$0xff]  }
  0x62   :  { %824 = vmatpush2.bf16.msra.mxu0 %v1688_v34  ;;  %v1751_v34 = vld [vmem:[#allocation5 + $0x244] ss:$8 sps:$4 sm:$0xff]  }
  0x63   :  { %825 = vmatprep.subr.bf16.mxu0 %v1692_v35  ;;  %865 = vmatpush2.bf16.msra.mxu1 %v1691_v36  ;;  %v171_v35 = vrot.slane %v1791_v31, %v2056_v51  ;;  %v1796_v36 = vld [vmem:[#allocation2 + $0x24] ss:$14 sps:$4 sm:$0xff]   ;;  %v1808_v19 = vld [vmem:[#allocation7 + $0x10] sm:$0xff]  }
  0x64   :  { %866 = vmatprep.subr.bf16.mxu1 %v1695_v40  ;;  %v178_v40 = vrot.slane %v1796_v36, %v2056_v51  ;;  %v1763_v51 = vld [vmem:[#allocation5 + $0x204] ss:$8 sps:$4 sm:$0xff]  }
  0x65   :  { %v1805_v16 = vld [vmem:[#allocation7 + $0x58] sm:$0xff]  }
  0x66   :  { %826 = vmatpush2.bf16.msra.mxu0 %v1694_v41  ;;  %v1754_v41 = vld [vmem:[#allocation5 + $0x234] ss:$8 sps:$4 sm:$0xff]   ;;  %v186_v5 = vcombine.low %v164_v38, %v178_v40 }
  0x67   :  { %827 = vmatprep.subr.bf16.mxu0 %v1698_v42  ;;  %867 = vmatpush2.bf16.msra.mxu1 %v1697_v43  ;;  %v188_v42 = vcombine.low %v171_v35, %v185_v37  ;;  %v187_v43 = vcombine.high %v164_v38, %v178_v40  ;;  %v305_v37 = vsub.s32 0, %v2053_v45  ;;  %v301_v38 = vld [vmem:[%s2104_s2] sm:$0x3] }
  0x68   :  { %868 = vmatprep.subr.bf16.mxu1 %v1701_v46  ;;  %v1752_v46 = vld [vmem:[#allocation5 + $0x230] ss:$8 sps:$4 sm:$0xff]  }
  0x69   :  { %v202_v44 = vpack.c.bf16 %v188_v42, %v188_v42  ;;  %v306_v40 = vrot.slane %v301_v38, %v305_v37 }
  0x6a   :  { %828 = vmatpush2.bf16.msra.mxu0 %v1700_v47  ;;  %v201_v47 = vpack.c.bf16 %v187_v43, %v187_v43 }
  0x6b   :  { %829 = vmatprep.subr.bf16.mxu0 %v1704_v49  ;;  %869 = vmatpush2.bf16.msra.mxu1 %v1703_v48  ;;  %v1757_v48 = vld [vmem:[#allocation5 + $0x224] ss:$8 sps:$4 sm:$0xff]   ;;  %v1755_v49 = vld [vmem:[#allocation5 + $0x220] ss:$8 sps:$4 sm:$0xff]  }
  0x6c   :  { %870 = vmatprep.subr.bf16.mxu1 %v1707_v52  ;;  %v1758_v52 = vld [vmem:[#allocation5 + $0x210] ss:$8 sps:$4 sm:$0xff]  }
  0x6e   :  { %830 = vmatpush2.bf16.msra.mxu0 %v1706_v50  ;;  %v1760_v50 = vld [vmem:[#allocation5 + $0x214] ss:$8 sps:$4 sm:$0xff]  }
  0x6f   :  { %831 = vmatprep.subr.bf16.mxu0 %v1710_v54  ;;  %871 = vmatpush2.bf16.msra.mxu1 %v1709_v56  ;;  %v1766_v54 = vld [vmem:[#allocation5 + $0x2f4] ss:$8 sps:$4 sm:$0xff]   ;;  %v1769_v56 = vld [vmem:[#allocation5 + $0x2e4] ss:$8 sps:$4 sm:$0xff]  }
  0x70   :  { %872 = vmatprep.subr.bf16.mxu1 %v1713_v57  ;;  %v1767_v57 = vld [vmem:[#allocation5 + $0x2e0] ss:$8 sps:$4 sm:$0xff]  }
  0x72   :  { %832 = vmatpush2.bf16.msra.mxu0 %v1712_v62  ;;  %v1778_v62 = vld [vmem:[#allocation5 + $0x2b4] ss:$8 sps:$4 sm:$0xff]  }
  0x73   :  { %833 = vmatprep.subr.bf16.mxu0 %v1716_v63  ;;  %873 = vmatpush2.bf16.msra.mxu1 %v1715_v3  ;;  %v1776_v63 = vld [vmem:[#allocation5 + $0x2b0] ss:$8 sps:$4 sm:$0xff]  }
  0x74   :  { %874 = vmatprep.subr.bf16.mxu1 %v1719_v4  ;;  %v1782_v3 = vld [vmem:[#allocation5 + $0x290] ss:$8 sps:$4 sm:$0xff]   ;;  %v1790_v4 = vld [vmem:[#allocation5 + $0x284] ss:$8 sps:$4 sm:$0xff]  }
  0x76   :  { %834 = vmatpush2.bf16.msra.mxu0 %v1718_v7  ;;  %v200_v7 = vpack.c.bf16 %v186_v5, %v186_v5  ;;  %v1824_v5 = vld [vmem:[#allocation10 + $0x20] sm:$0xff]  }
  0x77   :  { %835 = vmatprep.subr.bf16.mxu0 %v1722_v8  ;;  %875 = vmatpush2.bf16.msra.mxu1 %v1721_v10  ;;  %v1797_v8 = vld [vmem:[#allocation7 + $0x78] sm:$0xff]   ;;  %v1799_v10 = vld [vmem:[#allocation7 + $0x70] sm:$0xff]  }
  0x78   :  { %876 = vmatprep.subr.bf16.mxu1 %v1725_v11  ;;  %v1800_v11 = vld [vmem:[#allocation7 + $0x30] sm:$0xff]  }
  0x7a   :  { %836 = vmatpush2.bf16.msra.mxu0 %v1724_v12  ;;  %v1801_v12 = vld [vmem:[#allocation7 + $0x68] sm:$0xff]  }
  0x7b   :  { %837 = vmatprep.subr.bf16.mxu0 %v1728_v13  ;;  %877 = vmatpush2.bf16.msra.mxu1 %v1727_v14  ;;  %v1802_v13 = vld [vmem:[#allocation7 + $0x28] sm:$0xff]   ;;  %v1803_v14 = vld [vmem:[#allocation7 + $0x60] sm:$0xff]  }
  0x7c   :  { %878 = vmatprep.subr.bf16.mxu1 %v1731_v15  ;;  %v1804_v15 = vld [vmem:[#allocation7 + $0x20] sm:$0xff]  }
  0x7e   :  { %838 = vmatpush2.bf16.msra.mxu0 %v1730_v17  ;;  %v1806_v17 = vld [vmem:[#allocation7 + $0x18] sm:$0xff]  }
  0x7f   :  { %889 = vmatprep.subr.bf16.mxu0 %v1740_v18  ;;  %879 = vmatpush2.bf16.msra.mxu1 %v1737_v20  ;;  %v1807_v18 = vld [vmem:[#allocation7 + $0x50] sm:$0xff]   ;;  %v1809_v20 = vld [vmem:[#allocation7 + $0x48] sm:$0xff]  }
  0x80   :  { %944 = vmatprep.subr.bf16.mxu1 %v1787_v26 }
  0x81   :  { %840 = vmatmul.mubr.bf16.vlgmr.msra.gmra.mxu0 %v196_v21  ;;  %v1810_v21 = vld [vmem:[#allocation7 + $0x8] sm:$0xff]  }
  0x82   :  { %890 = vmatpush1.bf16.msra.mxu0 %v1738_v22  ;;  %881 = vmatmul.mubr.bf16.vlgmr.msra.gmra.mxu1 %v198_v23  ;;  %v1811_v22 = vld [vmem:[#allocation7 + $0x40] sm:$0xff]  }
  0x83   :  { %891 = vmatprep.subr.bf16.mxu0 %v1745_v24  ;;  %962 = vmatprep.mubr.bf16.mxu1 %v1973_v30  ;;  %v1812_v23 = vld [vmem:[#allocation7] sm:$0xff]   ;;  %v1974_v24 = vmov 0.0  }
  0x84   :  { %945 = vmatpush1.bf16.msra.mxu1 %v1785_v25  ;;  %921 = vmatprep.mubr.bf16.mxu0 %v201_v47 }
  0x85   :  { %1540 = vmatprep.subr.bf16.mxu1 %v1797_v8 }
  0x86   :  { %892 = vmatpush1.bf16.msra.mxu0 %v1743_v27 }
  0x87   :  { %893 = vmatprep.subr.bf16.mxu0 %v1748_v28 }
  0x8a   :  { %894 = vmatpush1.bf16.msra.mxu0 %v1746_v29  ;;  %1504 = vmatmul.mubr.msk.bf16.vlgmr.msra.gmra.mxu1 %vm803_vm0, %v202_v44 }
  0x8b   :  { %895 = vmatprep.subr.bf16.mxu0 %v1751_v34  ;;  %1541 = vmatpush3.bf16.msra.mxu1 %v1798_v9  ;;  %v1505_v9 = vld [vmem:[%s2106_s4] ss:$0 sm:$0xff] }
  0x8c   :  { %1542 = vmatprep.subr.bf16.mxu1 %v1799_v10 }
  0x8e   :  { %896 = vmatpush1.bf16.msra.mxu0 %v1749_v39  ;;  %v309_v39 = vsub.s32 1, %v2053_v45  ;;  %v1814_v45 = vld [vmem:[#allocation8 + $0x30] sm:$0xff]  }
  0x8f   :  { %897 = vmatprep.subr.bf16.mxu0 %v1754_v41  ;;  %1543 = vmatpush3.bf16.msra.mxu1 %v1800_v11 }
  0x90   :  { %1544 = vmatprep.subr.bf16.mxu1 %v1801_v12  ;;  %v310_v41 = vrot.slane %v301_v38, %v309_v39 }
  0x92   :  { %898 = vmatpush1.bf16.msra.mxu0 %v1752_v46 }
  0x93   :  { %899 = vmatprep.subr.bf16.mxu0 %v1757_v48  ;;  %1545 = vmatpush3.bf16.msra.mxu1 %v1802_v13 }
  0x94   :  { %1546 = vmatprep.subr.bf16.mxu1 %v1803_v14 }
  0x96   :  { %900 = vmatpush1.bf16.msra.mxu0 %v1755_v49 }
  0x97   :  { %901 = vmatprep.subr.bf16.mxu0 %v1760_v50  ;;  %1547 = vmatpush3.bf16.msra.mxu1 %v1804_v15 }
  0x98   :  { %1548 = vmatprep.subr.bf16.mxu1 %v1805_v16 }
  0x9a   :  { %902 = vmatpush1.bf16.msra.mxu0 %v1758_v52 }
  0x9b   :  { %903 = vmatprep.subr.bf16.mxu0 %v1763_v51  ;;  %1549 = vmatpush3.bf16.msra.mxu1 %v1806_v17  ;;  %v1827_v17 = vld [vmem:[#allocation10 + $0x8] sm:$0xff]  }
  0x9c   :  { %1550 = vmatprep.subr.bf16.mxu1 %v1807_v18  ;;  %v1828_v18 = vld [vmem:[#allocation10] sm:$0xff]  }
  0x9e   :  { %904 = vmatpush1.bf16.msra.mxu0 %v1761_v53 }
  0x9f   :  { %905 = vmatprep.subr.bf16.mxu0 %v1766_v54  ;;  %1551 = vmatpush3.bf16.msra.mxu1 %v1808_v19  ;;  %v1522_v19 = vld [vmem:[%s2108_s6] ss:$0 sm:$0xff] }
  0xa0   :  { %1552 = vmatprep.subr.bf16.mxu1 %v1809_v20 }
  0xa2   :  { %906 = vmatpush2.bf16.msra.mxu0 %v1764_v55 }
  0xa3   :  { %907 = vmatprep.subr.bf16.mxu0 %v1769_v56  ;;  %1553 = vmatpush3.bf16.msra.mxu1 %v1810_v21 }
  0xa4   :  { %1554 = vmatprep.subr.bf16.mxu1 %v1811_v22 }
  0xa6   :  { %908 = vmatpush2.bf16.msra.mxu0 %v1767_v57 }
  0xa7   :  { %909 = vmatprep.subr.bf16.mxu0 %v1772_v58  ;;  %1555 = vmatpush3.bf16.msra.mxu1 %v1812_v23  ;;  %v1813_v58 = vld [vmem:[#allocation8 + $0x38] sm:$0xff]  }
  0xa8   :  { %1580 = vmatprep.subr.bf16.mxu1 %v1974_v24 }
  0xaa   :  { %910 = vmatpush2.bf16.msra.mxu0 %v1770_v59 }
  0xab   :  { %911 = vmatprep.subr.bf16.mxu0 %v1775_v60  ;;  %v1815_v60 = vld [vmem:[#allocation8 + $0x28] sm:$0xff]  }
  0xae   :  { %912 = vmatpush2.bf16.msra.mxu0 %v1773_v61  ;;  %v1816_v61 = vld [vmem:[#allocation8 + $0x20] sm:$0xff]  }
  0xaf   :  { %913 = vmatprep.subr.bf16.mxu0 %v1778_v62  ;;  %v1817_v62 = vld [vmem:[#allocation8 + $0x18] sm:$0xff]  }
  0xb2   :  { %914 = vmatpush2.bf16.msra.mxu0 %v1776_v63  ;;  %v1818_v63 = vld [vmem:[#allocation8 + $0x10] sm:$0xff]  }
  0xb3   :  { %915 = vmatprep.subr.bf16.mxu0 %v1781_v0  ;;  %v1819_v0 = vld [vmem:[#allocation8 + $0x8] sm:$0xff]  }
  0xb6   :  { %916 = vmatpush2.bf16.msra.mxu0 %v1779_v1  ;;  %v1820_v1 = vld [vmem:[#allocation8] sm:$0xff]  }
  0xb7   :  { %917 = vmatprep.subr.bf16.mxu0 %v1784_v2  ;;  %v1821_v2 = vld [vmem:[#allocation10 + $0x38] sm:$0xff]  }
  0xba   :  { %918 = vmatpush2.bf16.msra.mxu0 %v1782_v3  ;;  %v1822_v3 = vld [vmem:[#allocation10 + $0x30] sm:$0xff]  }
  0xbb   :  { %919 = vmatprep.subr.bf16.mxu0 %v1790_v4  ;;  %v1823_v4 = vld [vmem:[#allocation10 + $0x28] sm:$0xff]  }
  0xbe   :  { %920 = vmatpush2.bf16.msra.mxu0 %v1788_v6  ;;  %v1825_v6 = vld [vmem:[#allocation10 + $0x18] sm:$0xff]  }
  0xbf   :  { %1600 = vmatprep.subr.bf16.mxu0 %v1974_v24 }
  0xc1   :  { %922 = vmatmul.mubr.bf16.vlgmr.msra.gmra.mxu0 %v200_v7  ;;  %v1826_v7 = vld [vmem:[#allocation10 + $0x10] sm:$0xff]  }
  0xc2   :  { %1616 = vmatprep.mubr.msk.bf16.mxu0 %vm1975_vm1, %v1974_v24  ;;  %1601 = vmatpush3.bf16.msra.mxu0 %v1821_v2 }
  0xc3   :  { %1602 = vmatprep.subr.bf16.mxu0 %v1974_v24 }
  0xc6   :  { %1603 = vmatpush3.bf16.msra.mxu0 %v1822_v3 }
  0xc7   :  { %1604 = vmatprep.subr.bf16.mxu0 %v1974_v24 }
  0xca   :  { %1605 = vmatpush3.bf16.msra.mxu0 %v1823_v4 }
  0xcb   :  { %1606 = vmatprep.subr.bf16.mxu0 %v1974_v24 }
  0xce   :  { %1607 = vmatpush3.bf16.msra.mxu0 %v1824_v5 }
  0xcf   :  { %1608 = vmatprep.subr.bf16.mxu0 %v1974_v24 }
  0xd2   :  { %1609 = vmatpush3.bf16.msra.mxu0 %v1825_v6 }
  0xd3   :  { %1610 = vmatprep.subr.bf16.mxu0 %v1974_v24 }
  0xd6   :  { %1611 = vmatpush3.bf16.msra.mxu0 %v1826_v7 }
  0xd7   :  { %1612 = vmatprep.subr.bf16.mxu0 %v1974_v24 }
  0xda   :  { %1613 = vmatpush3.bf16.msra.mxu0 %v1827_v17 }
  0xdb   :  { %1614 = vmatprep.subr.bf16.mxu0 %v1974_v24 }
  0xde   :  { %1615 = vmatpush3.bf16.msra.mxu0 %v1828_v18 }
 0x141   :  { %v841_v25 = vpop.f32.mrf.mxu0 }
 0x142   :  { %v882_v27 = vpop.f32.mrf.mxu1  ;;  %v842_v42 = vadd.f32 %v841_v25, %v306_v40 }
 0x143   :  { %v843_v26 = vpop.f32.mrf.mxu0 }
 0x144   :  { %v884_v29 = vpop.f32.mrf.mxu1  ;;  %v844_v43 = vadd.f32 %v843_v26, %v310_v41  ;;  %v883_v44 = vadd.f32 %v882_v27, %v842_v42 }
 0x145   :  { %v845_v28 = vpop.f32.mrf.mxu0 }
 0x146   :  { %v886_v31 = vpop.f32.mrf.mxu1  ;;  %v885_v47 = vadd.f32 %v884_v29, %v844_v43  ;;  %v1531_v28 = vld [vmem:[%s2110_s8] ss:$0 sm:$0xff] }
 0x147   :  { %v846_v30 = vpop.f32.mrf.mxu0 }
 0x148   :  { %v887_v32 = vpop.f32.mrf.mxu1 }
 0x14a   :  { %v964_v33 = vpop.f32.mrf.mxu1 }
 0x14c   :  { %v966_v34 = vpop.f32.mrf.mxu1 }
 0x14e   :  { %v968_v35 = vpop.f32.mrf.mxu1 }
 0x150   :  { %v969_v36 = vpop.f32.mrf.mxu1 }
 0x181   :  { %v923_v46 = vpop.f32.mrf.mxu0 }
 0x182   :  { %v924_v48 = vadd.f32 %v923_v46, %v883_v44 }
 0x183   :  { %v925_v49 = vpop.f32.mrf.mxu0 }
 0x184   :  { %v965_v50 = vadd.f32 %v964_v33, %v924_v48  ;;  %v926_v52 = vadd.f32 %v925_v49, %v885_v47 }
 0x185   :  { %v927_v51 = vpop.f32.mrf.mxu0 }
 0x186   :  { %v967_v53 = vadd.f32 %v966_v34, %v926_v52  ;;  %v971_v54 = vmax.f32 %v965_v50, 0.0 }
 0x187   :  { %v928_v55 = vpop.f32.mrf.mxu0 }
 0x188   :  { %v972_v56 = vmax.f32 %v967_v53, 0.0  ;;  %v973_v59 = vpack.c.bf16 %v971_v54, %v971_v54 }
 0x18a   :  { %v974_v57 = vpack.c.bf16 %v972_v56, %v972_v56 }
 0x18c   :  { %1142 = vmatprep.mubr.bf16.mxu1 %v974_v57 }
 0x18d   :  { %1143 = vmatmul.mubr.bf16.vlgmr.msra.gmra.mxu1 %v973_v59 }
 0x18e   :  { %1581 = vmatpush3.bf16.msra.mxu1 %v1813_v58  ;;  %1596 = vmatprep.mubr.msk.bf16.mxu1 %vm1975_vm1, %v1974_v24 }
 0x18f   :  { %1582 = vmatprep.subr.bf16.mxu1 %v1974_v24 }
 0x192   :  { %1583 = vmatpush3.bf16.msra.mxu1 %v1814_v45 }
 0x193   :  { %1584 = vmatprep.subr.bf16.mxu1 %v1974_v24 }
 0x196   :  { %1585 = vmatpush3.bf16.msra.mxu1 %v1815_v60 }
 0x197   :  { %1586 = vmatprep.subr.bf16.mxu1 %v1974_v24 }
 0x19a   :  { %1587 = vmatpush3.bf16.msra.mxu1 %v1816_v61 }
 0x19b   :  { %1588 = vmatprep.subr.bf16.mxu1 %v1974_v24 }
 0x19e   :  { %1589 = vmatpush3.bf16.msra.mxu1 %v1817_v62 }
 0x19f   :  { %1590 = vmatprep.subr.bf16.mxu1 %v1974_v24 }
 0x1a2   :  { %1591 = vmatpush3.bf16.msra.mxu1 %v1818_v63 }
 0x1a3   :  { %1592 = vmatprep.subr.bf16.mxu1 %v1974_v24 }
 0x1a6   :  { %1593 = vmatpush3.bf16.msra.mxu1 %v1819_v0 }
 0x1a7   :  { %1594 = vmatprep.subr.bf16.mxu1 %v1974_v24 }
 0x1aa   :  { %1595 = vmatpush3.bf16.msra.mxu1 %v1820_v1 }
 0x24d   :  { %v1556_v8 = vpop.f32.mrf.mxu1 }
 0x24f   :  { %v1557_v10 = vpop.f32.mrf.mxu1 }
 0x250   :  { %v1558_v11 = vadd.f32 %v1557_v10, %v1556_v8 }
 0x251   :  { %v1559_v12 = vpop.f32.mrf.mxu1 }
 0x252   :  { %v1145_v13 = vadd.f32 %v1558_v11, %v1505_v9 }
 0x253   :  { %v1560_v14 = vpop.f32.mrf.mxu1 }
 0x254   :  { %v1150_v15 = vmax.f32 %v1145_v13, 0.0 }
 0x256   :  { %v1151_v16 = vpack.c.bf16 %v1150_v15, %v1150_v15 }
 0x258   :  { %1597 = vmatmul.mubr.bf16.vlgmr.msra.gmra.mxu1 %v1151_v16 }
 0x318   :  { %v1257_v20 = vpop.f32.mrf.mxu1 }
 0x319   :  { %v1258_v21 = vadd.f32 %v1522_v19, %v1257_v20 }
 0x31a   :  { %v1598_v22 = vpop.f32.mrf.mxu1 }
 0x31b   :  { %v1263_v23 = vmax.f32 %v1258_v21, 0.0 }
 0x31c   :  { %v1260_v25 = vpop.f32.mrf.mxu1 }
 0x31d   :  { %v1264_v26 = vpack.c.bf16 %v1263_v23, %v1263_v23 }
 0x31e   :  { %v1599_v27 = vpop.f32.mrf.mxu1 }
 0x31f   :  { %1617 = vmatmul.mubr.bf16.vlgmr.msra.gmra.mxu0 %v1264_v26 }
 0x3df   :  { %v1370_v29 = vpop.f32.mrf.mxu0 }
 0x3e0   :  { %v1371_v24 = vadd.f32 %v1531_v28, %v1370_v29 }
 0x3e1   :  { %v1618_v30 = vpop.f32.mrf.mxu0 }
 0x3e2   :  { %1376 = vmax.xlane.f32.xlu0 %v1371_v24 }
 0x3e3   :  { %v1373_v31 = vpop.f32.mrf.mxu0 }
 0x3e5   :  { %v1619_v32 = vpop.f32.mrf.mxu0 }
 0x46b   :  { %v1377_v33 = vpop.xlane.xlu0 %1376 }
 0x46c   :  { %v1378_v34 = vsub.f32 %v1371_v24, %v1377_v33 }
 0x46e   :  { %v1379_v35 = vmul.f32 1.442695, %v1378_v34 }
 0x470   :  { %1829 = vpow2.f32 %v1379_v35 }
 0x47d   :  { %v1830_v36 = vpop.eup %1829 }
 0x47e   :  { %1381 = vadd.xlane.f32.xlu0 %v1830_v36 }
 0x507   :  { %v1382_v37 = vpop.xlane.xlu0 %1381 }
 0x508   :  { %1831 = vlog2.f32 %v1382_v37 }
 0x515   :  { %v1832_v38 = vpop.eup %1831 }
 0x516   :  { %v1384_v39 = vmul.f32 0.6931472, %v1832_v38 }
 0x518   :  { %v1385_v40 = vsub.f32 %v1378_v34, %v1384_v39 }
 0x51a   :  { %1386 = vst [vmem:[#allocation11] sm:$0xff] %v1385_v40 }
 0x51b   :  { %1391 = vsyncadd [#allocation4], 96  ;;  %s1976_s6 = smov [#allocation11]  }
 0x51c   :  { %s1392_s8 = sshll.u32 %s1976_s6, 4  ;;  %s1393_s8 = int_to_ptr.vmem [resolvable:$true] %s1392_s8 }
 0x51d   :  { %s1933_s21 = scalar_lea.vmem %s1393_s8, 32  ;;  %s1937_s22 = scalar_lea.vmem %s1393_s8, 128 }
 0x51e   :  { %p1934_p11 = scmp.ne.s32.totalorder %s1393_s8, %s1933_s21  ;;  %p1938_p12 = scmp.lt.s32.totalorder %s1393_s8, %s1393_s8 }
 0x51f   :  { %p1939_p13 = scmp.lt.s32.totalorder %s1937_s22, %s1933_s21 }
 0x521   :  { %p1940_p0 = por %p1939_p13, %p1938_p12 }
 0x523   :  { %p1941_p1 = pnand %p1940_p0, %p1934_p11 }
 0x525   :  { %1944 = shalt.err (!%p1941_p1)
}
 0x526   :  { %s1977_s23 = smov 32   ;;  %s1978_s24 = smov 2  }
 0x527   :  { %1398 = dma.vmem_to_hbm [thread:$0]  %s1393_s8, 32, %s2111_s9, [#allocation4], %s1977_s23, %s1977_s23, %s1978_s24  }
 0x528   :  { %1959 = dma.done.wait [#allocation4], 128  }
 0x529   :  { %1960 = vsyncadd [#allocation4], 4294967168 }
 0x52a   :  { %1402 = vsyncpa [#allocation3], 1 }
 0x52b   :  { %1403 = vsyncpa [#allocation6], 1 }
 0x52c   :  { %1404 = vsyncpa [#allocation9], 1 }
 0x52d   :  { %1405 = vsyncpa [#allocation4], 1 }

</bundles_post_ra>
